<compile_context>
chip_gen: v6e
topology: v6e:2x2x1
jax: 0.10.0
libtpu: 0.0.40
codegen_flags: <defaults>
</compile_context>

<pallas_src>
import functools

import jax
import jax.numpy as jnp
from jax.experimental import pallas as pl
from jax.experimental.pallas import tpu as pltpu


# ------------------------------ small helpers --------------------------------
def _round_up(x, m):
    return (x + m - 1) // m * m


def _cdiv(a, b):
    return -(-a // b)


def _ipow(x, n):
    """x**n for static integer n >= 1 using only VPU multiplies."""
    result = None
    base = x
    while n:
        if n & 1:
            result = base if result is None else result * base
        n >>= 1
        if n:
            base = base * base
    return result


# ----------------------------- Pallas kernel ---------------------------------
def _fused_focal_l1_kernel(*refs, flags, beta, gamma, bf16_tanh):
    """Accumulate sum_k sum_elem |x_k - t_k| * w_k over one (tile_r,128) tile.

    refs = (g_ref, x_ref_0 .. x_ref_{K-1}, out_ref, acc_ref)
      g_ref   : (tile_r, 128) downsampled-gt tile
      x_ref_k : (tile_r, 128) prediction tile; flags[k]==0 -> target gt, ==1 -> 1-gt
      out_ref : (1, 8, 128) per-parallel-chunk partial sum (written on last step)
      acc_ref : (tile_r, 128) f32 running partial (VMEM scratch)
    """
    K = len(flags)
    g_ref = refs[0]
    x_refs = refs[1:1 + K]
    out_ref = refs[1 + K]
    acc_ref = refs[2 + K]

    j = pl.program_id(1)

    @pl.when(j == 0)
    def _():
        acc_ref[...] = jnp.zeros_like(acc_ref)

    g = g_ref[...].astype(jnp.float32)
    gm = (1.0 - g) if any(flags) else None       # hoisted out of the K loop

    partial = None
    for k, f in enumerate(flags):                # K is tiny & static -> unrolled
        x = x_refs[k][...].astype(jnp.float32)
        d = jnp.abs(x - (gm if f else g))
        # 2*sigmoid(beta*d) - 1 == tanh(0.5*beta*d) exactly: one EUP op.
        a = (0.5 * beta) * d
        if bf16_tanh:                            # v6e/v7x only: ~2x EUP, ~0.4% err
            w = jnp.tanh(a.astype(jnp.bfloat16)).astype(jnp.float32)
        else:
            w = jnp.tanh(a)
        if gamma != 1:
            gf = float(gamma)
            if gf.is_integer() and gf >= 1:
                w = _ipow(w, int(gf))            # VPU multiplies, EUP stays free
            else:
                # TODO(synk): fractional gamma pays exp+log on the EUP; gamma<=0
                # with d==0 (padding) would NaN -- not a supported config.
                w = w ** gamma
        term = d * w
        partial = term if partial is None else partial + term

    acc_ref[...] += partial                      # pure VPU per step

    @pl.when(j == pl.num_programs(1) - 1)
    def _():
        # Fold (tile_r,128) -> (8,128) with static aligned slice adds (VPU only),
        # then one lane-dense unmasked store. Cross-chunk sum happens in XLA.
        tr = acc_ref.shape[0]
        folded = acc_ref[pl.ds(0, 8), :]
        for s in range(1, tr // 8):
            folded = folded + acc_ref[pl.ds(s * 8, 8), :]
        out_ref[0] = folded


# ------------------------------- wrapper --------------------------------------
_VMEM_BUDGET_BYTES = 24 << 20   # pipelined buffers + acc; headroom vs 32 MiB limit


def _pick_tiles(r_needed, K, max_itemsize):
    """Choose (n_par, steps_per_chunk, tile_r); tile_r first, padding is free."""
    # Per tile row: double-buffered (K preds + gt) in their own dtype + f32 acc.
    per_row = (K + 1) * 2 * 128 * max_itemsize + 128 * 4
    cap = max(16, (_VMEM_BUDGET_BYTES // per_row) // 16 * 16)
    tile_r = min(512, cap)
    n_par = 2 if r_needed >= 32 else 1           # v7x megacore split; harmless elsewhere
    r_core = _cdiv(r_needed, n_par)
    if r_core <= tile_r:
        tile_r = _round_up(max(r_core, 1), 16)   # multiple of 16: safe for bf16 packing
    steps = _cdiv(r_core, tile_r)
    return n_par, steps, tile_r


def _fused_weighted_focal_l1_sum(preds, flags, gt_flat, beta, gamma):
    """Sum over all K terms of sum(|x_k - t_k| * w_k), t_k = gt or 1-gt per flag."""
    K = len(preds)
    M = int(gt_flat.shape[0])
    itemsize = max([jnp.dtype(gt_flat.dtype).itemsize]
                   + [jnp.dtype(x.dtype).itemsize for x in preds])
    r_needed = _cdiv(M, 128)
    n_par, steps, tile_r = _pick_tiles(r_needed, K, itemsize)
    R = n_par * steps * tile_r
    pad = R * 128 - M

    # Lane/sublane-dense (R,128) slabs; pad values chosen so padded diff == 0
    # (gt pads 0; pos term pads 0; neg term pads 1). No dtype upcast here.
    g2 = jnp.pad(gt_flat, (0, pad)).reshape(R, 128)
    xs = [jnp.pad(x.reshape(-1), (0, pad), constant_values=float(f)).reshape(R, 128)
          for x, f in zip(preds, flags)]

    kernel = functools.partial(
        _fused_focal_l1_kernel, flags=tuple(int(f) for f in flags),
        beta=float(beta), gamma=gamma,
        bf16_tanh=False)   # flip to True on v6e/v7x if ~0.4% weight error is OK

    row_spec = pl.BlockSpec((tile_r, 128), lambda c, j: (c * steps + j, 0))
    partials = pl.pallas_call(
        kernel,
        out_shape=jax.ShapeDtypeStruct((n_par, 8, 128), jnp.float32),
        grid=(n_par, steps),
        in_specs=[row_spec] * (K + 1),
        out_specs=pl.BlockSpec((1, 8, 128), lambda c, j: (c, 0, 0)),
        scratch_shapes=[pltpu.VMEM((tile_r, 128), jnp.float32)],
        compiler_params=pltpu.CompilerParams(
            dimension_semantics=("parallel", "arbitrary"),
            vmem_limit_bytes=32 << 20),
    )(g2, *xs)
    return jnp.sum(partials)                     # tiny (n_par*8*128) XLA reduce


@functools.partial(jax.jit, static_argnames=("beta", "gamma"))
def sim_loss(pred, gt, beta=0.2, gamma=1):
    """Pallas/JAX port of SimLoss.forward(pred, gt).

    pred: list of dicts with 'pos_sim' (B, N) and 'neg_sim' ((B, N) or None).
    gt:   (B, C, H, W) array (NCHW).
    """
    B, _, H, W = gt.shape
    # F.interpolate(gt, scale_factor=0.0625), mode='nearest':
    # out size = floor(dim/16), src index = j*16  -> bounded stride-16 slice.
    gt_ds = gt[:, :, : (H // 16) * 16 : 16, : (W // 16) * 16 : 16].reshape(B, -1)
    gt_flat = gt_ds.reshape(-1)                  # original dtype; kernel casts
    M = gt_flat.shape[0]                         # == B * N (torch.mean divisor)

    preds, flags = [], []
    for i in range(len(pred)):                   # structure is static Python
        preds.append(pred[i]['pos_sim'])
        flags.append(0)                          # target = gt
        if pred[i]['neg_sim'] is not None:
            preds.append(pred[i]['neg_sim'])
            flags.append(1)                      # target = 1 - gt

    total = _fused_weighted_focal_l1_sum(preds, tuple(flags), gt_flat, beta, gamma)
    # each term's mean divides by B*N == M; the module divides by len(pred)
    return total / (jnp.float32(M) * len(pred))


# ---------------- pure-JAX references (for correctness checks) ----------------
def _ref_focal_l1(x, t, beta=0.2, gamma=1):
    d = jnp.abs(x.astype(jnp.float32) - t.astype(jnp.float32))
    return jnp.mean(d * (2.0 * jax.nn.sigmoid(beta * d) - 1.0) ** gamma)


def _ref_sim_loss(pred, gt):
    B, _, H, W = gt.shape
    gt_ds = gt[:, :, : (H // 16) * 16 : 16, : (W // 16) * 16 : 16].reshape(B, -1)
    loss = 0.0
    for i in range(len(pred)):
        loss = loss + _ref_focal_l1(pred[i]['pos_sim'], gt_ds)
        if pred[i]['neg_sim'] is not None:
            loss = loss + _ref_focal_l1(pred[i]['neg_sim'], 1.0 - gt_ds)
    return loss / len(pred)


def _ref_sum(preds, flags, g, beta, gamma):
    tot = 0.0
    for x, f in zip(preds, flags):
        t = 1.0 - g if f else g
        d = jnp.abs(x - t)
        tot = tot + jnp.sum(d * (2.0 * jax.nn.sigmoid(beta * d) - 1.0) ** gamma)
    return tot


if __name__ == "__main__":
    key = jax.random.PRNGKey(0)
    B, C, H, W = 2, 1, 64, 64                    # gt (2,1,64,64) -> 4x4 downsample -> N = 16
    N = C * (H // 16) * (W // 16)

    k1, k2, k3, k4, k5, k6, k7 = jax.random.split(key, 7)
    gt = (jax.random.uniform(k1, (B, C, H, W)) > 0.5).astype(jnp.float32)
    pred = [
        {'pos_sim': jax.random.uniform(k2, (B, N), dtype=jnp.float32),
         'neg_sim': jax.random.uniform(k3, (B, N), dtype=jnp.float32)},
        {'pos_sim': jax.random.uniform(k4, (B, N), dtype=jnp.float32),
         'neg_sim': None},
    ]

    out = jax.block_until_ready(sim_loss(pred, gt))
    ref = _ref_sim_loss(pred, gt)
    assert abs(float(out) - float(ref)) < 1e-5, (float(out), float(ref))

    # Larger flat check: exercises the 2-way parallel grid, multi-step reduction
    # and the integer-gamma (VPU square) path.
    M2 = 200_000
    x_pos = jax.random.uniform(k5, (M2,), dtype=jnp.float32)
    x_neg = jax.random.uniform(k6, (M2,), dtype=jnp.float32)
    g_big = (jax.random.uniform(k7, (M2,)) > 0.5).astype(jnp.float32)
    out2 = jax.block_until_ready(
        _fused_weighted_focal_l1_sum([x_pos, x_neg], (0, 1), g_big, 0.2, 2))
    ref2 = _ref_sum([x_pos, x_neg], (0, 1), g_big, 0.2, 2)
    rel = abs(float(out2) - float(ref2)) / max(1.0, abs(float(ref2)))
    assert rel < 1e-4, (float(out2), float(ref2))

    print("KERNEL_OK")
</pallas_src>

<mosaic_0001>
module attributes {stable_mosaic.version = 11 : i64} {
  func.func @_fused_focal_l1_kernel(%arg0: i32, %arg1: i32, %arg2: memref<16x128xf32, #tpu.memory_space<vmem>>, %arg3: memref<16x128xf32, #tpu.memory_space<vmem>>, %arg4: memref<16x128xf32, #tpu.memory_space<vmem>>, %arg5: memref<16x128xf32, #tpu.memory_space<vmem>>, %arg6: memref<1x8x128xf32, #tpu.memory_space<vmem>>, %arg7: memref<16x128xf32, #tpu.memory_space<vmem>>) attributes {dimension_semantics = [#tpu.dimension_semantics<parallel>, #tpu.dimension_semantics<arbitrary>], iteration_bounds = array<i64: 1, 1>, scalar_prefetch = 0 : i64, scratch_operands = 1 : i64, tpu.core_type = #tpu.core_type<tc>, window_params = [{transform_indices = @transform_0, window_bounds = array<i64: 16, 128>}, {transform_indices = @transform_1, window_bounds = array<i64: 16, 128>}, {transform_indices = @transform_2, window_bounds = array<i64: 16, 128>}, {transform_indices = @transform_3, window_bounds = array<i64: 16, 128>}, {transform_indices = @transform_4, window_bounds = array<i64: 1, 8, 128>}]} {
    %c0_i32 = arith.constant 0 : i32
    %0 = arith.cmpi eq, %arg1, %c0_i32 : i32
    %1 = arith.extui %0 : i1 to i32
    %c0_i32_0 = arith.constant 0 : i32
    %2 = arith.cmpi ne, %1, %c0_i32_0 : i32
    scf.if %2 {
      %cst_17 = arith.constant 0.000000e+00 : f32
      %35 = vector.broadcast %cst_17 : f32 to vector<16x128xf32>
      %c0_18 = arith.constant 0 : index
      %c0_19 = arith.constant 0 : index
      %36 = vector.load %arg7[%c0_18, %c0_19] : memref<16x128xf32, #tpu.memory_space<vmem>>, vector<16x128xf32>
      tpu.vector_store %arg7[%c0_18, %c0_19], %35 {strides = array<i32>} : memref<16x128xf32, #tpu.memory_space<vmem>>, vector<16x128xf32>,
    } else {
    }
    %c0 = arith.constant 0 : index
    %c0_1 = arith.constant 0 : index
    %3 = vector.load %arg2[%c0, %c0_1] : memref<16x128xf32, #tpu.memory_space<vmem>>, vector<16x128xf32>
    %cst = arith.constant 1.000000e+00 : f32
    %4 = vector.broadcast %cst : f32 to vector<16x128xf32>
    %5 = arith.subf %4, %3 : vector<16x128xf32>
    %c0_2 = arith.constant 0 : index
    %c0_3 = arith.constant 0 : index
    %6 = vector.load %arg3[%c0_2, %c0_3] : memref<16x128xf32, #tpu.memory_space<vmem>>, vector<16x128xf32>
    %7 = arith.subf %6, %3 : vector<16x128xf32>
    %8 = math.absf %7 : vector<16x128xf32>
    %cst_4 = arith.constant 1.000000e-01 : f32
    %9 = vector.broadcast %cst_4 : f32 to vector<16x128xf32>
    %10 = arith.mulf %9, %8 : vector<16x128xf32>
    %11 = math.tanh %10 : vector<16x128xf32>
    %12 = arith.mulf %8, %11 : vector<16x128xf32>
    %c0_5 = arith.constant 0 : index
    %c0_6 = arith.constant 0 : index
    %13 = vector.load %arg4[%c0_5, %c0_6] : memref<16x128xf32, #tpu.memory_space<vmem>>, vector<16x128xf32>
    %14 = arith.subf %13, %5 : vector<16x128xf32>
    %15 = math.absf %14 : vector<16x128xf32>
    %cst_7 = arith.constant 1.000000e-01 : f32
    %16 = vector.broadcast %cst_7 : f32 to vector<16x128xf32>
    %17 = arith.mulf %16, %15 : vector<16x128xf32>
    %18 = math.tanh %17 : vector<16x128xf32>
    %19 = arith.mulf %15, %18 : vector<16x128xf32>
    %20 = arith.addf %12, %19 : vector<16x128xf32>
    %c0_8 = arith.constant 0 : index
    %c0_9 = arith.constant 0 : index
    %21 = vector.load %arg5[%c0_8, %c0_9] : memref<16x128xf32, #tpu.memory_space<vmem>>, vector<16x128xf32>
    %22 = arith.subf %21, %3 : vector<16x128xf32>
    %23 = math.absf %22 : vector<16x128xf32>
    %cst_10 = arith.constant 1.000000e-01 : f32
    %24 = vector.broadcast %cst_10 : f32 to vector<16x128xf32>
    %25 = arith.mulf %24, %23 : vector<16x128xf32>
    %26 = math.tanh %25 : vector<16x128xf32>
    %27 = arith.mulf %23, %26 : vector<16x128xf32>
    %28 = arith.addf %20, %27 : vector<16x128xf32>
    %c0_11 = arith.constant 0 : index
    %c0_12 = arith.constant 0 : index
    %29 = vector.load %arg7[%c0_11, %c0_12] : memref<16x128xf32, #tpu.memory_space<vmem>>, vector<16x128xf32>
    %30 = arith.addf %29, %28 : vector<16x128xf32>
    %c0_13 = arith.constant 0 : index
    %c0_14 = arith.constant 0 : index
    %31 = vector.load %arg7[%c0_13, %c0_14] : memref<16x128xf32, #tpu.memory_space<vmem>>, vector<16x128xf32>
    tpu.vector_store %arg7[%c0_13, %c0_14], %30 {strides = array<i32>} : memref<16x128xf32, #tpu.memory_space<vmem>>, vector<16x128xf32>,
    %c0_i32_15 = arith.constant 0 : i32
    %32 = arith.cmpi eq, %arg1, %c0_i32_15 : i32
    %33 = arith.extui %32 : i1 to i32
    %c0_i32_16 = arith.constant 0 : i32
    %34 = arith.cmpi ne, %33, %c0_i32_16 : i32
    scf.if %34 {
      %c0_17 = arith.constant 0 : index
      %c0_18 = arith.constant 0 : index
      %35 = vector.load %arg7[%c0_17, %c0_18] : memref<16x128xf32, #tpu.memory_space<vmem>>, vector<8x128xf32>
      %c8 = arith.constant 8 : index
      %c0_19 = arith.constant 0 : index
      %36 = vector.load %arg7[%c8, %c0_19] : memref<16x128xf32, #tpu.memory_space<vmem>>, vector<8x128xf32>
      %37 = arith.addf %35, %36 : vector<8x128xf32>
      %c0_20 = arith.constant 0 : index
      %c0_21 = arith.constant 0 : index
      %c0_22 = arith.constant 0 : index
      %38 = vector.load %arg6[%c0_20, %c0_21, %c0_22] : memref<1x8x128xf32, #tpu.memory_space<vmem>>, vector<1x8x128xf32>
      %39 = vector.shape_cast %38 : vector<1x8x128xf32> to vector<8x128xf32>
      %40 = vector.shape_cast %37 : vector<8x128xf32> to vector<1x8x128xf32>
      tpu.vector_store %arg6[%c0_20, %c0_21, %c0_22], %40 {strides = array<i32>} : memref<1x8x128xf32, #tpu.memory_space<vmem>>, vector<1x8x128xf32>,
    } else {
    }
    return
  }
  func.func @transform_0(%arg0: i32, %arg1: i32) -> (i32, i32) {
    %c1_i32 = arith.constant 1 : i32
    %0 = arith.muli %arg0, %c1_i32 : i32
    %1 = arith.addi %0, %arg1 : i32
    %c0_i32 = arith.constant 0 : i32
    %c0_i32_0 = arith.constant 0 : i32
    return %1, %c0_i32 : i32, i32
  }
  func.func @transform_1(%arg0: i32, %arg1: i32) -> (i32, i32) {
    %c1_i32 = arith.constant 1 : i32
    %0 = arith.muli %arg0, %c1_i32 : i32
    %1 = arith.addi %0, %arg1 : i32
    %c0_i32 = arith.constant 0 : i32
    %c0_i32_0 = arith.constant 0 : i32
    return %1, %c0_i32 : i32, i32
  }
  func.func @transform_2(%arg0: i32, %arg1: i32) -> (i32, i32) {
    %c1_i32 = arith.constant 1 : i32
    %0 = arith.muli %arg0, %c1_i32 : i32
    %1 = arith.addi %0, %arg1 : i32
    %c0_i32 = arith.constant 0 : i32
    %c0_i32_0 = arith.constant 0 : i32
    return %1, %c0_i32 : i32, i32
  }
  func.func @transform_3(%arg0: i32, %arg1: i32) -> (i32, i32) {
    %c1_i32 = arith.constant 1 : i32
    %0 = arith.muli %arg0, %c1_i32 : i32
    %1 = arith.addi %0, %arg1 : i32
    %c0_i32 = arith.constant 0 : i32
    %c0_i32_0 = arith.constant 0 : i32
    return %1, %c0_i32 : i32, i32
  }
  func.func @transform_4(%arg0: i32, %arg1: i32) -> (i32, i32, i32) {
    %c0_i32 = arith.constant 0 : i32
    %c0_i32_0 = arith.constant 0 : i32
    %c0_i32_1 = arith.constant 0 : i32
    return %arg0, %c0_i32, %c0_i32_0 : i32, i32, i32
  }
}

</mosaic_0001>

<bundles_post_ra>
// kernel: sim_loss.1
= control target key start
LH: loop header
LB: loop body
LE: loop exit
PB: predicated region body
PF: predicated region fallthrough
CT: control target
= control target key end

     0   :  { %s260_s0 = inlined_call_operand.vmem [shape: f32[16,128], index: 0, kind: input, shape index: {}]   ;;  %s261_s1 = inlined_call_operand.vmem [shape: f32[16,128], index: 1, kind: input, shape index: {}]   ;;  %s262_s2 = inlined_call_operand.vmem [shape: f32[16,128], index: 2, kind: input, shape index: {}]   ;;  %s263_s3 = inlined_call_operand.vmem [shape: f32[16,128], index: 3, kind: input, shape index: {}]   ;;  %s264_s4 = inlined_call_operand.vmem [shape: f32[1,8,128], index: 4, kind: output, shape index: {}]  }
   0x1   :  { %v111_v0 = vld [vmem:[%s260_s0] sm:$0xff]  ;;  %v112_v1 = vld [vmem:[%s260_s0 + $0x8] sm:$0xff] }
   0x2   :  { %v115_v2 = vld [vmem:[%s261_s1] sm:$0xff]  ;;  %v113_v3 = vsub.f32 1.0, %v111_v0  ;;  %v114_v4 = vsub.f32 1.0, %v112_v1  ;;  %v116_v5 = vld [vmem:[%s261_s1 + $0x8] sm:$0xff] }
   0x3   :  { %v117_v6 = vsub.f32 %v115_v2, %v111_v0  ;;  %v127_v7 = vld [vmem:[%s262_s2] sm:$0xff]  ;;  %v128_v8 = vld [vmem:[%s262_s2 + $0x8] sm:$0xff]  ;;  %v118_v9 = vsub.f32 %v116_v5, %v112_v1 }
   0x4   :  { %v141_v10 = vld [vmem:[%s263_s3] sm:$0xff]  ;;  %v142_v11 = vld [vmem:[%s263_s3 + $0x8] sm:$0xff]  ;;  %v129_v13 = vsub.f32 %v127_v7, %v113_v3  ;;  %v130_v14 = vsub.f32 %v128_v8, %v114_v4 }
   0x5   :  { %v119_v12 = vand.u32 2147483647, %v117_v6  ;;  %v143_v15 = vsub.f32 %v141_v10, %v111_v0  ;;  %v120_v16 = vand.u32 2147483647, %v118_v9  ;;  %v144_v17 = vsub.f32 %v142_v11, %v112_v1 }
   0x6   :  { %v131_v19 = vand.u32 2147483647, %v129_v13  ;;  %v132_v20 = vand.u32 2147483647, %v130_v14 }
   0x7   :  { %v121_v18 = vmul.f32 0.1, %v119_v12  ;;  %v122_v21 = vmul.f32 0.1, %v120_v16  ;;  %v145_v22 = vand.u32 2147483647, %v143_v15 }
   0x8   :  { %v146_v23 = vand.u32 2147483647, %v144_v17  ;;  %v133_v24 = vmul.f32 0.1, %v131_v19  ;;  %v134_v25 = vmul.f32 0.1, %v132_v20 }
   0x9   :  { %196 = vtanh.f32 %v121_v18  ;;  %v147_v26 = vmul.f32 0.1, %v145_v22 }
   0xa   :  { %198 = vtanh.f32 %v122_v21  ;;  %v148_v27 = vmul.f32 0.1, %v146_v23 }
   0xb   :  { %200 = vtanh.f32 %v133_v24 }
   0xc   :  { %202 = vtanh.f32 %v134_v25 }
   0xd   :  { %204 = vtanh.f32 %v147_v26 }
   0xe   :  { %206 = vtanh.f32 %v148_v27 }
  0x16   :  { %v197_v28 = vpop.eup %196 }
  0x17   :  { %v199_v29 = vpop.eup %198  ;;  %v125_v30 = vmul.f32 %v197_v28, %v119_v12 }
  0x18   :  { %v201_v31 = vpop.eup %200  ;;  %v126_v32 = vmul.f32 %v199_v29, %v120_v16 }
  0x19   :  { %v203_v33 = vpop.eup %202  ;;  %v137_v34 = vmul.f32 %v201_v31, %v131_v19 }
  0x1a   :  { %v205_v35 = vpop.eup %204  ;;  %v138_v36 = vmul.f32 %v203_v33, %v132_v20 }
  0x1b   :  { %v207_v37 = vpop.eup %206  ;;  %v139_v38 = vadd.f32 %v137_v34, %v125_v30  ;;  %v151_v39 = vmul.f32 %v205_v35, %v145_v22 }
  0x1c   :  { %v140_v40 = vadd.f32 %v138_v36, %v126_v32  ;;  %v152_v41 = vmul.f32 %v207_v37, %v146_v23 }
  0x1d   :  { %v153_v42 = vadd.f32 %v151_v39, %v139_v38 }
  0x1e   :  { %v154_v43 = vadd.f32 %v152_v41, %v140_v40 }
  0x20   :  { %v166_v44 = vadd.f32 %v154_v43, %v153_v42 }
  0x22   :  { %167 = vst [vmem:[%s264_s4] sm:$0xff] %v166_v44 }

</bundles_post_ra>
